<compile_context>
chip_gen: v5e
topology: v5e:2x2
jax: 0.10.0
libtpu: 0.0.40
codegen_flags: <defaults>
</compile_context>

<pallas_src>
import jax
import jax.numpy as jnp
from jax.experimental import pallas as pl
from jax.experimental.pallas import tpu as pltpu


LANE = 128
BF16_SUBLANE = 16  # bf16 packs 16 rows per vreg


def _round_up(x, m):
    return ((x + m - 1) // m) * m


def generator_kernel(z_ref, w1_ref, b1_ref, w2_ref, b2_ref, out_ref):
    # First (tiny) matmul, recomputed per grid step so there is no
    # cross-iteration state -> every grid axis can be "parallel".
    h = jnp.dot(z_ref[...], w1_ref[...], preferred_element_type=jnp.float32)
    h = jnp.maximum(h + b1_ref[...], 0.0).astype(jnp.bfloat16)

    # Second matmul over this lane-dense output (N) tile.
    y = jnp.dot(h, w2_ref[...], preferred_element_type=jnp.float32)
    y = y + b2_ref[...]
    out_ref[...] = jnp.tanh(y).astype(out_ref.dtype)


def _select_tiling():
    """Pick (tile_n, vmem_limit_bytes) per TPU generation."""
    try:
        vmem = pltpu.get_tpu_info().vmem_capacity_bytes
    except Exception:
        vmem = 64 << 20  # conservative (v7x-like)
    if vmem >= (96 << 20):       # v5e / v6e: 128 MiB physical VMEM
        return 1024, 64 << 20
    return 512, 32 << 20         # v7x: 64 MiB physical VMEM


def generator_forward(z, params, img_shape):
    """Noise z (B, Z) -> image (B, C, H, W) through the fused generator net."""
    w1, b1, w2, b2 = params            # bf16 weights (K padded), f32 biases
    B = z.shape[0]
    C, H, W = img_shape
    out_dim = C * H * W
    zp_dim, hidden = w1.shape

    # --- M (batch) tiling: 16-row min for bf16 packing; 256 rows once the
    # batch can fill a 256x256 MXU, else 128.
    if B >= 256:
        tile_m = 256
    elif B >= LANE:
        tile_m = LANE
    else:
        tile_m = _round_up(B, BF16_SUBLANE)
    b_pad = _round_up(B, tile_m)

    # --- N (output) tiling: per-generation tile size, then pad out_dim up to
    # a multiple of it so stores are always lane-dense and w2 blocks bounded.
    tile_n, vmem_limit = _select_tiling()
    tile_n = min(tile_n, _round_up(out_dim, LANE))
    out_pad = _round_up(out_dim, tile_n)

    # Zero-pad noise: batch rows + feature lanes up to the padded weight K dim.
    z_p = jnp.zeros((b_pad, zp_dim), dtype=jnp.bfloat16)
    z_p = z_p.at[:B, : z.shape[1]].set(z.astype(jnp.bfloat16))

    # Zero-pad w2 / b2 columns to the padded output width.
    if out_pad != out_dim:
        w2_p = jnp.zeros((hidden, out_pad), dtype=w2.dtype)
        w2_p = w2_p.at[:, :out_dim].set(w2)
        b2_p = jnp.zeros((1, out_pad), dtype=b2.dtype)
        b2_p = b2_p.at[:, :out_dim].set(b2)
    else:
        w2_p, b2_p = w2, b2

    grid = (b_pad // tile_m, out_pad // tile_n)
    n_tiles_n = grid[1]

    cost = pl.CostEstimate(
        flops=2 * b_pad * (n_tiles_n * zp_dim * hidden + hidden * out_pad),
        transcendentals=b_pad * out_pad,                       # tanh
        bytes_accessed=(hidden * out_pad * 2                   # w2 (bf16)
                        + b_pad * zp_dim * 2                   # z
                        + b_pad * out_pad * 2                  # out
                        + zp_dim * hidden * 2                  # w1
                        + 4 * (hidden + out_pad)),             # biases (f32)
    )

    flat = pl.pallas_call(
        generator_kernel,
        out_shape=jax.ShapeDtypeStruct((b_pad, out_pad), jnp.bfloat16),
        grid=grid,
        in_specs=[
            pl.BlockSpec((tile_m, zp_dim), lambda i, j: (i, 0)),   # z
            pl.BlockSpec((zp_dim, hidden), lambda i, j: (0, 0)),   # w1
            pl.BlockSpec((1, hidden), lambda i, j: (0, 0)),        # b1
            pl.BlockSpec((hidden, tile_n), lambda i, j: (0, j)),   # w2 (N-tiled)
            pl.BlockSpec((1, tile_n), lambda i, j: (0, j)),        # b2 (N-tiled)
        ],
        out_specs=pl.BlockSpec((tile_m, tile_n), lambda i, j: (i, j)),
        compiler_params=pltpu.CompilerParams(
            # No cross-iteration state -> both axes independent; on v7x the
            # N tiles can be split across both TensorCores even at B <= 128.
            dimension_semantics=("parallel", "parallel"),
            vmem_limit_bytes=vmem_limit,
        ),
        cost_estimate=cost,
    )(z_p, w1, b1, w2_p, b2_p)

    # Slice off batch / output padding and reshape to NCHW outside the kernel
    # (keeps the kernel's stores lane-dense).
    return flat[:B, :out_dim].reshape(B, C, H, W)


def init_params(key, z_dim, hidden, out_dim):
    k1, k2, k3, k4 = jax.random.split(key, 4)
    # Deterministic, small-scale synthetic init (not a checkpoint load).
    w1 = jax.random.normal(k1, (z_dim, hidden), dtype=jnp.float32) * 0.05
    b1 = jax.random.normal(k2, (1, hidden), dtype=jnp.float32) * 0.01
    w2 = jax.random.normal(k3, (hidden, out_dim), dtype=jnp.float32) * 0.05
    b2 = jax.random.normal(k4, (1, out_dim), dtype=jnp.float32) * 0.01
    return w1, b1, w2, b2


def prepare_params(params):
    """Pad w1's K dim to a lane multiple and cast MXU operands to bf16."""
    w1, b1, w2, b2 = params
    z_dim = w1.shape[0]
    zp = _round_up(z_dim, LANE)
    w1_p = jnp.zeros((zp, w1.shape[1]), dtype=jnp.bfloat16)
    w1_p = w1_p.at[:z_dim].set(w1.astype(jnp.bfloat16))
    return w1_p, b1, w2.astype(jnp.bfloat16), b2


if __name__ == "__main__":
    # Small shapes consistent with a GAN generator forward:
    #   noise z: (batch=2, z_dim=32)  ->  image: (2, 4, 16, 16)  (NCHW)
    B, Z = 2, 32
    C, H, W = 4, 16, 16
    HIDDEN = 128
    OUT = C * H * W

    key = jax.random.PRNGKey(0)
    k_noise, k_params = jax.random.split(key)

    z = jax.random.normal(k_noise, (B, Z), dtype=jnp.float32)
    raw_params = init_params(k_params, Z, HIDDEN, OUT)
    params = prepare_params(raw_params)

    img = generator_forward(z, params, (C, H, W))
    img = jax.block_until_ready(img)

    # Pure-JAX reference with the same bf16 operands / f32 accumulation.
    w1, b1, w2, b2 = raw_params
    h_ref = jnp.maximum(
        jnp.dot(z.astype(jnp.bfloat16), w1.astype(jnp.bfloat16),
                preferred_element_type=jnp.float32) + b1, 0.0)
    y_ref = jnp.dot(h_ref.astype(jnp.bfloat16), w2.astype(jnp.bfloat16),
                    preferred_element_type=jnp.float32) + b2
    ref = jnp.tanh(y_ref).reshape(B, C, H, W)

    assert img.shape == (B, C, H, W)
    assert jnp.allclose(img.astype(jnp.float32), ref, atol=2e-2, rtol=2e-2)

    print("KERNEL_OK")
</pallas_src>

<mosaic_0001>
module attributes {stable_mosaic.version = 11 : i64} {
  func.func @generator_kernel(%arg0: i32, %arg1: i32, %arg2: memref<16x128xbf16, #tpu.memory_space<vmem>>, %arg3: memref<128x128xbf16, #tpu.memory_space<vmem>>, %arg4: memref<1x128xf32, #tpu.memory_space<vmem>>, %arg5: memref<128x512xbf16, #tpu.memory_space<vmem>>, %arg6: memref<1x512xf32, #tpu.memory_space<vmem>>, %arg7: memref<16x512xbf16, #tpu.memory_space<vmem>>) attributes {dimension_semantics = [#tpu.dimension_semantics<parallel>, #tpu.dimension_semantics<parallel>], iteration_bounds = array<i64: 1, 2>, scalar_prefetch = 0 : i64, scratch_operands = 0 : i64, tpu.core_type = #tpu.core_type<tc>, window_params = [{transform_indices = @transform_0, window_bounds = array<i64: 16, 128>}, {pipeline_mode = #tpu.pipeline_mode<synchronous>, transform_indices = @transform_1, window_bounds = array<i64: 128, 128>}, {pipeline_mode = #tpu.pipeline_mode<synchronous>, transform_indices = @transform_2, window_bounds = array<i64: 1, 128>}, {transform_indices = @transform_3, window_bounds = array<i64: 128, 512>}, {transform_indices = @transform_4, window_bounds = array<i64: 1, 512>}, {transform_indices = @transform_5, window_bounds = array<i64: 16, 512>}]} {
    %c0 = arith.constant 0 : index
    %c0_0 = arith.constant 0 : index
    %0 = vector.load %arg2[%c0, %c0_0] : memref<16x128xbf16, #tpu.memory_space<vmem>>, vector<16x128xbf16>
    %c0_1 = arith.constant 0 : index
    %c0_2 = arith.constant 0 : index
    %1 = vector.load %arg3[%c0_1, %c0_2] : memref<128x128xbf16, #tpu.memory_space<vmem>>, vector<128x128xbf16>
    %cst = arith.constant dense<0.000000e+00> : vector<16x128xf32>
    %2 = tpu.matmul %0, %1, %cst {dimension_numbers = #tpu.dot_dimension_numbers<[1], [0], [0], [1], [0, 0, 1, 1], [], []>} : vector<16x128xbf16>, vector<128x128xbf16>, vector<16x128xf32> -> vector<16x128xf32>
    %c0_3 = arith.constant 0 : index
    %c0_4 = arith.constant 0 : index
    %3 = vector.load %arg4[%c0_3, %c0_4] : memref<1x128xf32, #tpu.memory_space<vmem>>, vector<1x128xf32>
    %4 = vector.broadcast %3 : vector<1x128xf32> to vector<16x128xf32>
    %5 = arith.addf %2, %4 : vector<16x128xf32>
    %cst_5 = arith.constant 0.000000e+00 : f32
    %6 = vector.broadcast %cst_5 : f32 to vector<16x128xf32>
    %7 = arith.maximumf %5, %6 : vector<16x128xf32>
    %8 = arith.truncf %7 : vector<16x128xf32> to vector<16x128xbf16>
    %c0_6 = arith.constant 0 : index
    %c0_7 = arith.constant 0 : index
    %9 = vector.load %arg5[%c0_6, %c0_7] : memref<128x512xbf16, #tpu.memory_space<vmem>>, vector<128x512xbf16>
    %cst_8 = arith.constant dense<0.000000e+00> : vector<16x512xf32>
    %10 = tpu.matmul %8, %9, %cst_8 {dimension_numbers = #tpu.dot_dimension_numbers<[1], [0], [0], [1], [0, 0, 1, 1], [], []>} : vector<16x128xbf16>, vector<128x512xbf16>, vector<16x512xf32> -> vector<16x512xf32>
    %c0_9 = arith.constant 0 : index
    %c0_10 = arith.constant 0 : index
    %11 = vector.load %arg6[%c0_9, %c0_10] : memref<1x512xf32, #tpu.memory_space<vmem>>, vector<1x512xf32>
    %12 = vector.broadcast %11 : vector<1x512xf32> to vector<16x512xf32>
    %13 = arith.addf %10, %12 : vector<16x512xf32>
    %14 = math.tanh %13 : vector<16x512xf32>
    %15 = arith.truncf %14 : vector<16x512xf32> to vector<16x512xbf16>
    %c0_11 = arith.constant 0 : index
    %c0_12 = arith.constant 0 : index
    %16 = vector.load %arg7[%c0_11, %c0_12] : memref<16x512xbf16, #tpu.memory_space<vmem>>, vector<16x512xbf16>
    tpu.vector_store %arg7[%c0_11, %c0_12], %15 {strides = array<i32>} : memref<16x512xbf16, #tpu.memory_space<vmem>>, vector<16x512xbf16>,
    return
  }
  func.func @transform_0(%arg0: i32, %arg1: i32) -> (i32, i32) {
    %c0_i32 = arith.constant 0 : i32
    %c0_i32_0 = arith.constant 0 : i32
    return %arg0, %c0_i32 : i32, i32
  }
  func.func @transform_1(%arg0: i32, %arg1: i32) -> (i32, i32) {
    %c0_i32 = arith.constant 0 : i32
    %c0_i32_0 = arith.constant 0 : i32
    %c0_i32_1 = arith.constant 0 : i32
    return %c0_i32, %c0_i32_0 : i32, i32
  }
  func.func @transform_2(%arg0: i32, %arg1: i32) -> (i32, i32) {
    %c0_i32 = arith.constant 0 : i32
    %c0_i32_0 = arith.constant 0 : i32
    %c0_i32_1 = arith.constant 0 : i32
    return %c0_i32, %c0_i32_0 : i32, i32
  }
  func.func @transform_3(%arg0: i32, %arg1: i32) -> (i32, i32) {
    %c0_i32 = arith.constant 0 : i32
    %c0_i32_0 = arith.constant 0 : i32
    return %c0_i32, %arg1 : i32, i32
  }
  func.func @transform_4(%arg0: i32, %arg1: i32) -> (i32, i32) {
    %c0_i32 = arith.constant 0 : i32
    %c0_i32_0 = arith.constant 0 : i32
    return %c0_i32, %arg1 : i32, i32
  }
  func.func @transform_5(%arg0: i32, %arg1: i32) -> (i32, i32) {
    %c0_i32 = arith.constant 0 : i32
    return %arg0, %arg1 : i32, i32
  }
}

</mosaic_0001>

<bundles_post_ra>
// kernel: tpu_custom_call.1
= control target key start
LH: loop header
LB: loop body
LE: loop exit
PB: predicated region body
PF: predicated region fallthrough
CT: control target
= control target key end

     0   :  { %s1694_s0 = inlined_call_operand.hbm [shape: bf16[16,128], index: 0, kind: input, shape index: {}]   ;;  %s1695_s1 = inlined_call_operand.hbm [shape: bf16[128,128], index: 1, kind: input, shape index: {}]   ;;  %s1696_s2 = inlined_call_operand.vmem [shape: f32[1,128], index: 2, kind: input, shape index: {}]   ;;  %s1697_s3 = inlined_call_operand.hbm [shape: bf16[128,1024], index: 3, kind: input, shape index: {}]   ;;  %s1698_s4 = inlined_call_operand.hbm [shape: f32[1,1024], index: 4, kind: input, shape index: {}]   ;;  %s1699_s5 = inlined_call_operand.hbm [shape: bf16[16,1024], index: 5, kind: output, shape index: {}]  }
   0x1   :  { %1710 = sst [smem:[#allocation20_spill]] %s1694_s0 }
   0x2   :  { %1711 = sst [smem:[#allocation21_spill]] %s1695_s1 }
   0x3   :  { %1712 = sst [smem:[#allocation22_spill]] %s1697_s3 }
   0x4   :  { %1713 = sst [smem:[#allocation23_spill]] %s1699_s5 }
   0x5   :  { %10 = vsyncpa [#allocation3], 0 }
   0x6   :  { %11 = vsyncpa [#allocation6], 0 }
   0x7   :  { %12 = vsyncpa [#allocation4], 0 }
   0x8   :  { %14 = vsyncpa [#allocation4 + $0x1], 0  ;;  %s1444_s18 = smov 0   ;;  %s1446_s19 = smov 0  }
   0x9   :  { %s1448_s20 = smov 0   ;;  %s1450_s21 = smov 0  }
   0xa   :  { %s1452_s22 = smov 0   ;;  %s1454_s23 = smov 0  }
   0xb LB: > { %1714 = sst [smem:[#allocation14_spill]] %s1382_s18  ;;  %s1475_s24 = sadd.s32 4294967295, %s1402_s23   ;;  %s1402_s23 = sphi %s1454_s23, %s20_s23   ;;  %s1398_s22 = sphi %s1452_s22, %s1744_s22   ;;  %s1394_s21 = sphi %s1450_s21, %s1743_s21   ;;  %s1390_s20 = sphi %s1448_s20, %s1742_s20   ;;  %s1386_s19 = sphi %s1446_s19, %s1741_s19   ;;  %s1382_s18 = sphi %s1444_s18, %s1740_s18  }
   0xc   : > { %1715 = sst [smem:[#allocation15_spill]] %s1402_s23  ;;  %s851_s25 = sadd.s32 4294967294, %s1402_s23  }
   0xd   : > { %p114_p0 = scmp.ne.s32.totalorder %s1390_s20, %s1386_s19  ;;  %p115_p1 = scmp.eq.s32.totalorder %s1402_s23, 0 }
   0xe   : > { %p120_p2 = scmp.ne.s32.totalorder %s1386_s19, %s1382_s18  ;;  %p121_p3 = scmp.eq.s32.totalorder %s1475_s24, 0 }
   0xf   : > { %p172_p4 = scmp.eq.s32.totalorder %s1475_s24, 1  ;;  %p1486_p5 = por %p115_p1, %p114_p0 }
  0x10   : > { %p178_p6 = scmp.eq.s32.totalorder %s851_s25, 1  ;;  %p1492_p7 = por %p121_p3, %p120_p2 }
  0x11   : > { %p1496_p8 = por %p172_p4, %p114_p0  ;;  %p852_p10 = scmp.ge.s32.totalorder %s1402_s23, 1 }
  0x12   : > { %p1500_p9 = por %p178_p6, %p120_p2  ;;  %p185_p11 = scmp.lt.s32.totalorder %s1402_s23, 3 }
  0x13   : > { %s1718_s29 = scalar_select %p1496_p8, 1, 0 }
  0x14   : > { %s1720_s30 = scalar_select %p1500_p9, 1, 0 }
  0x15   : > { %1719 = sst [smem:[#allocation16_spill]] %s1718_s29  ;;  %p1509_p12 = pnand %p852_p10, %p185_p11 }
  0x16   : > { %1721 = sst [smem:[#allocation17_spill]] %s1720_s30  ;;  %s1404_s10 = smov [#allocation2]  }
  0x17   : > { %s1722_s0 = sld [smem:[#allocation20_spill]]  ;;  %s201_s11 = sshll.u32 %s1404_s10, 4  ;;  %s202_s11 = int_to_ptr.vmem [resolvable:$true] %s201_s11 }
  0x18   : > { %p1093_p13 = pneg %p1509_p12  ;;  %p855_p0 = scmp.ge.s32.totalorder %s1402_s23, 2 }
  0x19   : > { %p1113_p2 = scmp.lt.s32.totalorder %s1402_s23, 2  ;;  %s232_s13 = sand.u32 1, %s1402_s23  }
  0x1a   : > { %p1518_p1 = pnand %p1093_p13, %p121_p3  ;;  %s1703_s15 = smov 64  }
  0x1b   : > { %p1526_p4 = pnand %p1113_p2, %p1486_p5  ;;  %s1704_s16 = smov 4  }
  0x1c   : > { %s29_s17 = sadd.s32 1, %s1398_s22  ;;  %s234_s25 = sand.u32 1, %s1390_s20  }
  0x1d   : > { %s199_s8 = sshll.u32 %s1722_s0, 4  ;;  %p30_p6 = scmp.ge.s32.totalorder %s29_s17, 2  ;;  %s200_s8 = int_to_ptr.hbm [resolvable:$true] %s199_s8 }
  0x1e   : > { %1096 = dma.hbm_to_vmem [thread:$0]  (!%p1518_p1), %s200_s8, 128, %s202_s11, [#allocation3], %s1703_s15, %s1703_s15, %s1704_s16  }
  0x1f   : > { %s856_s6 = sshll.u32 %s234_s25, 8  ;;  %s1036_s7 = sshll.u32 %s1398_s22, 4 }
  0x20   : > { %s1746_s17 = smov (%p30_p6, %s29_s17), 0  ;;  %s1727_s3 = sld [smem:[#allocation22_spill]] }
  0x21   : > { %1726 = sst [smem:[#allocation18_spill]] %s1746_s17  ;;  %s104_s0 = ssub.s32 %s1398_s22, %s1746_s17 }
  0x22   : > { %p105_p5 = scmp.eq.s32.totalorder %s104_s0, 0  ;;  %s236_s30 = scalar_lea.vmem [#allocation7], %s856_s6 }
  0x23   : > { %s244_s8 = sshll.u32 %s236_s30, 4  ;;  %s1728_s11 = sadd.s32 1, %s1390_s20  ;;  %s245_s8 = int_to_ptr.vmem [resolvable:$true] %s244_s8 }
  0x24   : > { %s1548_s15 = scalar_select %p105_p5, %s1390_s20, %s1728_s11  }
  0x25   : > { %s1730_s1 = sld [smem:[#allocation21_spill]]  ;;  %s233_s5 = scalar_lea.sflag [#allocation3], %s232_s13 }
  0x26   : > { %s241_s26 = scalar_lea.hbm %s1727_s3, %s1036_s7  ;;  %1729 = sst [smem:[#allocation19_spill]] %s1548_s15 }
  0x27   : > { %s242_s23 = sshll.u32 %s241_s26, 4  ;;  %s1407_s27 = smov 512   ;;  %s243_s23 = int_to_ptr.hbm [resolvable:$true] %s242_s23 }
  0x28   : > { %s1408_s10 = smov 256   ;;  %s1409_s7 = smov 16  }
  0x29   : > { %1103 = dma.hbm_to_vmem [thread:$0]  (!%p1526_p4), %s243_s23, 4096, %s245_s8, %s233_s5, %s1407_s27, %s1408_s10, %s1409_s7  }
  0x2a   : > { %s1410_s0 = smov [#allocation5]   ;;  %s859_s6 = sshll.u32 %s234_s25, 2 }
  0x2b   : > { %s213_s29 = sshll.u32 %s1730_s1, 4  ;;  %s215_s26 = sshll.u32 %s1410_s0, 4  ;;  %s214_s29 = int_to_ptr.hbm [resolvable:$true] %s213_s29  ;;  %s216_s26 = int_to_ptr.vmem [resolvable:$true] %s215_s26 }
  0x2c   : > { %s1731_s30 = smov 4   ;;  %s1732_s11 = smov 64  }
  0x2d   : > { %1099 = dma.hbm_to_vmem [thread:$0]  (!%p1518_p1), %s214_s29, 1024, %s216_s26, [#allocation6], %s1732_s11, %s1732_s11, %s1731_s30  }
  0x2e   : > { %s860_s3 = sshll.u32 %s1398_s22, 2  ;;  %s258_s18 = scalar_lea.vmem [#allocation8], %s859_s6 }
  0x2f   : > { %s266_s16 = sshll.u32 %s258_s18, 4  ;;  %s262_s17 = scalar_lea.hbm %s1698_s4, %s860_s3  ;;  %s267_s16 = int_to_ptr.vmem [resolvable:$true] %s266_s16 }
  0x30   : > { %s264_s15 = sshll.u32 %s262_s17, 4  ;;  %275 = sbr.rel (%p1509_p12) target bundleno = 389 (0x185), region = 40  ;;  %s265_s15 = int_to_ptr.hbm [resolvable:$true] %s264_s15 }
  0x31   : > { %1106 = dma.hbm_to_vmem [thread:$0]  (!%p1526_p4), %s265_s15, 64, %s267_s16, %s233_s5  }
  0x35   : > { %1365 = dma.done.wait (%p121_p3), [#allocation3], 128  }
  0x36   : > { %1367 = vsyncadd (%p121_p3), [#allocation3], 4294967168 }
  0x37   : > { %1369 = dma.done.wait (%p121_p3), [#allocation6], 1024  }
  0x38   : > { %1371 = vsyncadd (%p121_p3), [#allocation6], 4294966272  ;;  %s287_s1 = sand.u32 1, %s1475_s24   ;;  %s1578_s3 = sand.u32 1, %s1386_s19  }
  0x39   : > { %s864_s5 = sshll.u32 %s1578_s3, 8  ;;  %s288_s23 = scalar_lea.sflag [#allocation3], %s287_s1 }
  0x3a   : > { %s1581_s29 = scalar_lea.vmem [#allocation7], %s864_s5 }
  0x3b   : > { %1373 = dma.done.wait (%p1492_p7), %s288_s23, 4160  }
  0x3c   : > { %1375 = vsyncadd (%p1492_p7), %s288_s23, 4294963136  ;;  %v1045_v0 = vld [vmem:[#allocation5 + $0x38] sm:$0xff]  ;;  %v1044_v1 = vld [vmem:[#allocation5 + $0x30] sm:$0xff]  ;;  %s865_s9 = sshll.u32 %s1578_s3, 2  ;;  %s866_s14 = sshll.u32 %s1578_s3, 5 }
  0x3d   : > { %415 = vmatpush.bf16.msra.mxu0 %v1045_v0  ;;  %v1017_v2 = vld [vmem:[%s1581_s29 + $0xe0] sm:$0xf]  ;;  %v1076_v3 = vld [vmem:[%s1581_s29 + $0xec] sm:$0xf0]  ;;  %v1074_v4 = vld [vmem:[%s1581_s29 + $0xe4] sm:$0xf] }
  0x3e   : > { %v1018_v5 = vor.u32 %v1076_v3, %v1017_v2  ;;  %v1019_v6 = vld [vmem:[%s1581_s29 + $0xf0] sm:$0xf0]  ;;  %v1025_v7 = vld [vmem:[%s1581_s29 + $0xe8] sm:$0xf]  ;;  %v1077_v8 = vld [vmem:[%s1581_s29 + $0xf4] sm:$0xf0] }
  0x3f   : > { %v1043_v9 = vld [vmem:[#allocation5 + $0x28] sm:$0xff]  ;;  %v1022_v10 = vor.u32 %v1074_v4, %v1019_v6  ;;  %v1026_v11 = vor.u32 %v1077_v8, %v1025_v7  ;;  %v1001_v12 = vld [vmem:[%s1581_s29 + $0xc0] sm:$0xf]  ;;  %v1072_v13 = vld [vmem:[%s1581_s29 + $0xcc] sm:$0xf0]  ;;  %s301_s12 = scalar_lea.vmem [#allocation8], %s865_s9 }
  0x40   : > { %634 = vmatpush.bf16.msra.mxu1 %v1018_v5  ;;  %v1070_v14 = vld [vmem:[%s1581_s29 + $0xc4] sm:$0xf]  ;;  %v1003_v15 = vld [vmem:[%s1581_s29 + $0xd0] sm:$0xf0]  ;;  %v1002_v16 = vor.u32 %v1072_v13, %v1001_v12  ;;  %v1009_v18 = vld [vmem:[%s1581_s29 + $0xc8] sm:$0xf] }
  0x41   : > { %416 = vmatpush.bf16.msra.mxu0 %v1044_v1  ;;  %648 = vmatpush.bf16.msra.mxu2 %v1022_v10  ;;  %v1006_v17 = vor.u32 %v1070_v14, %v1003_v15  ;;  %v1073_v19 = vld [vmem:[%s1581_s29 + $0xd4] sm:$0xf0]  ;;  %v985_v21 = vld [vmem:[%s1581_s29 + $0xa0] sm:$0xf]  ;;  %v1068_v22 = vld [vmem:[%s1581_s29 + $0xac] sm:$0xf0] }
  0x42   : > { %662 = vmatpush.bf16.msra.mxu3 %v1026_v11  ;;  %v1010_v20 = vor.u32 %v1073_v19, %v1009_v18  ;;  %v1066_v23 = vld [vmem:[%s1581_s29 + $0xa4] sm:$0xf]  ;;  %v987_v24 = vld [vmem:[%s1581_s29 + $0xb0] sm:$0xf0]  ;;  %v993_v25 = vld [vmem:[%s1581_s29 + $0xa8] sm:$0xf]  ;;  %v986_v27 = vor.u32 %v1068_v22, %v985_v21 }
  0x43   : > { %v1042_v26 = vld [vmem:[#allocation5 + $0x20] sm:$0xff]  ;;  %v1069_v28 = vld [vmem:[%s1581_s29 + $0xb4] sm:$0xf0]  ;;  %v990_v29 = vor.u32 %v1066_v23, %v987_v24  ;;  %v1064_v32 = vld [vmem:[%s1581_s29 + $0x8c] sm:$0xf0]  ;;  %s1078_s15 = sshll.u32 %s1394_s21, 4 }
  0x44   : > { %635 = vmatpush.bf16.msra.mxu1 %v1002_v16  ;;  %v994_v30 = vor.u32 %v1069_v28, %v993_v25  ;;  %v969_v31 = vld [vmem:[%s1581_s29 + $0x80] sm:$0xf]  ;;  %v1062_v33 = vld [vmem:[%s1581_s29 + $0x84] sm:$0xf]  ;;  %v971_v34 = vld [vmem:[%s1581_s29 + $0x90] sm:$0xf0] }
  0x45   : > { %417 = vmatpush.bf16.msra.mxu0 %v1043_v9  ;;  %649 = vmatpush.bf16.msra.mxu2 %v1006_v17  ;;  %v977_v35 = vld [vmem:[%s1581_s29 + $0x88] sm:$0xf]  ;;  %v1065_v36 = vld [vmem:[%s1581_s29 + $0x94] sm:$0xf0]  ;;  %v970_v38 = vor.u32 %v1064_v32, %v969_v31  ;;  %v974_v39 = vor.u32 %v1062_v33, %v971_v34  ;;  %v1040_v41 = vld [vmem:[#allocation5 + $0x10] sm:$0xff]  ;;  %s333_s17 = scalar_lea.vmem [#allocation9], %s866_s14 }
  0x46   : > { %663 = vmatpush.bf16.msra.mxu3 %v1010_v20  ;;  %v1041_v37 = vld [vmem:[#allocation5 + $0x18] sm:$0xff]  ;;  %v978_v40 = vor.u32 %v1065_v36, %v977_v35  ;;  %v1039_v42 = vld [vmem:[#allocation5 + $0x8] sm:$0xff]  ;;  %v1038_v45 = vld [vmem:[#allocation5] sm:$0xff]  ;;  %s1733_s27 = sld [smem:[#allocation23_spill]]  ;;  %s722_s7 = sshll.u32 %s333_s17, 4  ;;  %s723_s7 = int_to_ptr.vmem [resolvable:$true] %s722_s7 }
  0x47   : > { %v1075_v43 = vld [vmem:[%s1581_s29 + $0xec] sm:$0xf]  ;;  %v1027_v44 = vld [vmem:[%s1581_s29 + $0xf8] sm:$0xf0]  ;;  %v953_v57 = vld [vmem:[%s1581_s29 + $0x60] sm:$0xf] }
  0x48   : > { %636 = vmatpush.bf16.msra.mxu1 %v986_v27  ;;  %v1030_v46 = vor.u32 %v1075_v43, %v1027_v44  ;;  %v1071_v47 = vld [vmem:[%s1581_s29 + $0xcc] sm:$0xf]  ;;  %v1011_v48 = vld [vmem:[%s1581_s29 + $0xd8] sm:$0xf0]  ;;  %v1060_v58 = vld [vmem:[%s1581_s29 + $0x6c] sm:$0xf0] }
  0x49   : > { %418 = vmatpush.bf16.msra.mxu0 %v1042_v26  ;;  %650 = vmatpush.bf16.msra.mxu2 %v990_v29  ;;  %v1037_v49 = vld [vmem:[#allocation2] sm:$0xff]  ;;  %v1014_v50 = vor.u32 %v1071_v47, %v1011_v48  ;;  %v1067_v51 = vld [vmem:[%s1581_s29 + $0xac] sm:$0xf]  ;;  %v1058_v59 = vld [vmem:[%s1581_s29 + $0x64] sm:$0xf]  ;;  %v954_v60 = vor.u32 %v1060_v58, %v953_v57  ;;  %s707_s21 = scalar_lea.sflag [#allocation4], %s1578_s3 }
  0x4a   : > { %664 = vmatpush.bf16.msra.mxu3 %v994_v30  ;;  %v995_v52 = vld [vmem:[%s1581_s29 + $0xb8] sm:$0xf0]  ;;  %v1063_v54 = vld [vmem:[%s1581_s29 + $0x8c] sm:$0xf]  ;;  %v955_v61 = vld [vmem:[%s1581_s29 + $0x70] sm:$0xf0] }
  0x4b   : > { %v998_v53 = vor.u32 %v1067_v51, %v995_v52  ;;  %v979_v55 = vld [vmem:[%s1581_s29 + $0x98] sm:$0xf0]  ;;  %v961_v62 = vld [vmem:[%s1581_s29 + $0x68] sm:$0xf]  ;;  %v1061_v63 = vld [vmem:[%s1581_s29 + $0x74] sm:$0xf0]  ;;  %v958_v0 = vor.u32 %v1058_v59, %v955_v61 }
  0x4c   : > { %637 = vmatpush.bf16.msra.mxu1 %v970_v38  ;;  %v982_v56 = vor.u32 %v1063_v54, %v979_v55  ;;  %v962_v1 = vor.u32 %v1061_v63, %v961_v62  ;;  %v1059_v2 = vld [vmem:[%s1581_s29 + $0x6c] sm:$0xf]  ;;  %v963_v3 = vld [vmem:[%s1581_s29 + $0x78] sm:$0xf0]  ;;  %v937_v5 = vld [vmem:[%s1581_s29 + $0x40] sm:$0xf]  ;;  %s721_s10 = scalar_lea.hbm %s1733_s27, %s1078_s15 }
  0x4d   : > { %419 = vmatpush.bf16.msra.mxu0 %v1041_v37  ;;  %651 = vmatpush.bf16.msra.mxu2 %v974_v39  ;;  %v966_v4 = vor.u32 %v1059_v2, %v963_v3  ;;  %v1056_v6 = vld [vmem:[%s1581_s29 + $0x4c] sm:$0xf0]  ;;  %v1054_v7 = vld [vmem:[%s1581_s29 + $0x44] sm:$0xf]  ;;  %v939_v9 = vld [vmem:[%s1581_s29 + $0x50] sm:$0xf0] }
  0x4e   : > { %665 = vmatpush.bf16.msra.mxu3 %v978_v40  ;;  %v938_v8 = vor.u32 %v1056_v6, %v937_v5  ;;  %v945_v10 = vld [vmem:[%s1581_s29 + $0x48] sm:$0xf]  ;;  %v1057_v11 = vld [vmem:[%s1581_s29 + $0x54] sm:$0xf0]  ;;  %v942_v12 = vor.u32 %v1054_v7, %v939_v9  ;;  %v1055_v14 = vld [vmem:[%s1581_s29 + $0x4c] sm:$0xf] }
  0x4f   : > { %v946_v13 = vor.u32 %v1057_v11, %v945_v10  ;;  %v947_v15 = vld [vmem:[%s1581_s29 + $0x58] sm:$0xf0]  ;;  %v921_v17 = vld [vmem:[%s1581_s29 + $0x20] sm:$0xf]  ;;  %v1052_v18 = vld [vmem:[%s1581_s29 + $0x2c] sm:$0xf0] }
  0x50   : > { %638 = vmatpush.bf16.msra.mxu1 %v954_v60  ;;  %v950_v16 = vor.u32 %v1055_v14, %v947_v15  ;;  %v1050_v19 = vld [vmem:[%s1581_s29 + $0x24] sm:$0xf]  ;;  %v922_v20 = vor.u32 %v1052_v18, %v921_v17  ;;  %v923_v21 = vld [vmem:[%s1581_s29 + $0x30] sm:$0xf0]  ;;  %v929_v22 = vld [vmem:[%s1581_s29 + $0x28] sm:$0xf] }
  0x51   : > { %420 = vmatpush.bf16.msra.mxu0 %v1040_v41  ;;  %652 = vmatpush.bf16.msra.mxu2 %v958_v0  ;;  %v1053_v23 = vld [vmem:[%s1581_s29 + $0x34] sm:$0xf0]  ;;  %v926_v24 = vor.u32 %v1050_v19, %v923_v21  ;;  %v1051_v26 = vld [vmem:[%s1581_s29 + $0x2c] sm:$0xf]  ;;  %v931_v27 = vld [vmem:[%s1581_s29 + $0x38] sm:$0xf0] }
  0x52   : > { %666 = vmatpush.bf16.msra.mxu3 %v962_v1  ;;  %v930_v25 = vor.u32 %v1053_v23, %v929_v22  ;;  %v934_v28 = vor.u32 %v1051_v26, %v931_v27  ;;  %v905_v29 = vld [vmem:[%s1581_s29] sm:$0xf]  ;;  %v1048_v30 = vld [vmem:[%s1581_s29 + $0xc] sm:$0xf0]  ;;  %v1046_v31 = vld [vmem:[%s1581_s29 + $0x4] sm:$0xf] }
  0x53   : > { %v906_v32 = vor.u32 %v1048_v30, %v905_v29  ;;  %v907_v33 = vld [vmem:[%s1581_s29 + $0x10] sm:$0xf0]  ;;  %v913_v34 = vld [vmem:[%s1581_s29 + $0x8] sm:$0xf]  ;;  %v1049_v35 = vld [vmem:[%s1581_s29 + $0x14] sm:$0xf0] }
  0x54   : > { %639 = vmatpush.bf16.msra.mxu1 %v938_v8  ;;  %v910_v36 = vor.u32 %v1046_v31, %v907_v33  ;;  %v914_v37 = vor.u32 %v1049_v35, %v913_v34  ;;  %v1047_v38 = vld [vmem:[%s1581_s29 + $0xc] sm:$0xf]  ;;  %v915_v39 = vld [vmem:[%s1581_s29 + $0x18] sm:$0xf0]  ;;  %s724_s26 = sshll.u32 %s721_s10, 4  ;;  %s1332_s16 = scalar_lea.hbm %s1733_s27, 64  ;;  %s725_s26 = int_to_ptr.hbm [resolvable:$true] %s724_s26 }
  0x55   : > { %421 = vmatpush.bf16.msra.mxu0 %v1039_v42  ;;  %653 = vmatpush.bf16.msra.mxu2 %v942_v12  ;;  %v918_v40 = vor.u32 %v1047_v38, %v915_v39  ;;  %v1175_v42 = vld [vmem:[%s1696_s2] ss:$0 sm:$0xff]  ;;  %s1326_s6 = sshra.s32 %s725_s26, 4  ;;  %s1327_s6 = int_to_ptr.hbm [resolvable:$true] %s1326_s6 }
  0x56   : > { %667 = vmatpush.bf16.msra.mxu3 %v946_v13  ;;  %s1328_s30 = scalar_lea.hbm %s1327_s6, 32  ;;  %p1333_p11 = scmp.lt.s32.totalorder %s1327_s6, %s1733_s27 }
  0x57   : > { %p1329_p3 = scmp.ne.s32.totalorder %s1327_s6, %s1328_s30  ;;  %p1334_p12 = scmp.lt.s32.totalorder %s1332_s16, %s1328_s30 }
  0x58   : > { %640 = vmatpush.bf16.msra.mxu1 %v922_v20 }
  0x59   : > { %422 = vmatpush.bf16.msra.mxu0 %v1038_v45  ;;  %654 = vmatpush.bf16.msra.mxu2 %v926_v24  ;;  %p1330_p7 = pnand %p1329_p3, %p1496_p8  ;;  %p1335_p13 = por %p1334_p12, %p1333_p11 }
  0x5a   : > { %668 = vmatpush.bf16.msra.mxu3 %v930_v25 }
  0x5b   : > { %p1331_p10 = pneg %p1330_p7 }
  0x5c   : > { %423 = vmatmul.bf16.vlgmr.msra.gmra.mxu0 %v1037_v49  ;;  %641 = vmatpush.bf16.msra.mxu1 %v906_v32  ;;  %v464_v49 = vld [vmem:[%s301_s12] sm:$0xf] }
  0x5d   : > { %676 = vmatpush.bf16.msrb.mxu0 %v1030_v46  ;;  %655 = vmatpush.bf16.msra.mxu2 %v910_v36  ;;  %v469_v52 = vperm.slane %v464_v49, 3  ;;  %v467_v55 = vperm.slane %v464_v49, 1  ;;  %v468_v57 = vperm.slane %v464_v49, 2  ;;  %p1336_p1 = pnand %p1335_p13, %p1331_p10 }
  0x5e   : > { %669 = vmatpush.bf16.msra.mxu3 %v914_v37 }
  0x61   : > { %677 = vmatpush.bf16.msrb.mxu0 %v1014_v50  ;;  %v466_v50 = vperm.slane %v464_v49, 0 }
  0x65   : > { %678 = vmatpush.bf16.msrb.mxu0 %v998_v53 }
  0x69   : > { %679 = vmatpush.bf16.msrb.mxu0 %v982_v56 }
  0x6d   : > { %680 = vmatpush.bf16.msrb.mxu0 %v966_v4 }
  0x71   : > { %681 = vmatpush.bf16.msrb.mxu0 %v950_v16 }
  0x75   : > { %682 = vmatpush.bf16.msrb.mxu0 %v934_v28 }
  0x79   : > { %683 = vmatpush.bf16.msrb.mxu0 %v918_v40 }
  0xd9   : > { %v424_v41 = vpop.f32.mrf.mxu0 }
  0xda   : > { %v425_v43 = vadd.f32 %v1175_v42, %v424_v41 }
  0xdc   : > { %v429_v46 = vmax.f32 %v425_v43, 0.0 }
  0xe1   : > { %v426_v44 = vpop.f32.mrf.mxu0 }
  0xe2   : > { %v427_v45 = vadd.f32 %v1175_v42, %v426_v44 }
  0xe4   : > { %v430_v47 = vmax.f32 %v427_v45, 0.0 }
  0xe6   : > { %v431_v48 = vpack.c.bf16 %v430_v47, %v429_v46 }
  0xe8   : > { %642 = vmatmul.bf16.vlgmr.msra.gmra.mxu1 %v431_v48  ;;  %656 = vmatmul.bf16.vlgmr.msra.gmra.mxu2 %v431_v48 }
  0xe9   : > { %670 = vmatmul.bf16.vlgmr.msra.gmra.mxu3 %v431_v48  ;;  %684 = vmatmul.bf16.vlgmr.msrb.gmra.mxu0 %v431_v48 }
 0x165   : > { %v643_v51 = vpop.f32.mrf.mxu1 }
 0x166   : > { %v685_v53 = vpop.f32.mrf.mxu0  ;;  %v644_v54 = vadd.f32 %v643_v51, %v466_v50 }
 0x167   : > { %v686_v56 = vadd.f32 %v685_v53, %v469_v52 }
 0x168   : > { %1176 = vtanh.f32 %v644_v54 }
 0x169   : > { %1178 = vtanh.f32 %v686_v56 }
 0x16b   : > { %v657_v58 = vpop.f32.mrf.mxu2 }
 0x16c   : > { %v658_v59 = vadd.f32 %v657_v58, %v467_v55  ;;  %v671_v60 = vpop.f32.mrf.mxu3 }
 0x16d   : > { %v672_v61 = vadd.f32 %v671_v60, %v468_v57  ;;  %v645_v62 = vpop.f32.mrf.mxu1 }
 0x16e   : > { %1180 = vtanh.f32 %v658_v59  ;;  %v687_v63 = vpop.f32.mrf.mxu0  ;;  %v646_v0 = vadd.f32 %v645_v62, %v466_v50  ;;  %v1177_v2 = vpop.eup %1176 }
 0x16f   : > { %1182 = vtanh.f32 %v672_v61  ;;  %v688_v1 = vadd.f32 %v687_v63, %v469_v52  ;;  %v1179_v3 = vpop.eup %1178 }
 0x170   : > { %1184 = vtanh.f32 %v646_v0 }
 0x171   : > { %1186 = vtanh.f32 %v688_v1 }
 0x173   : > { %v659_v4 = vpop.f32.mrf.mxu2 }
 0x174   : > { %v1181_v5 = vpop.eup %1180  ;;  %v660_v6 = vadd.f32 %v659_v4, %v467_v55  ;;  %v673_v7 = vpop.f32.mrf.mxu3 }
 0x175   : > { %v1183_v8 = vpop.eup %1182  ;;  %v698_v9 = vpack.c.bf16 %v1181_v5, %v1177_v2  ;;  %v674_v10 = vadd.f32 %v673_v7, %v468_v57 }
 0x176   : > { %v699_v11 = vpack.c.bf16 %v1179_v3, %v1183_v8  ;;  %1188 = vtanh.f32 %v660_v6  ;;  %v1185_v12 = vpop.eup %1184 }
 0x177   : > { %702 = vst [vmem:[%s333_s17] sm:$0xff] %v698_v9  ;;  %1190 = vtanh.f32 %v674_v10  ;;  %v1187_v13 = vpop.eup %1186 }
 0x178   : > { %703 = vst [vmem:[%s333_s17 + $0x8] sm:$0xff] %v699_v11 }
 0x17c   : > { %v1189_v14 = vpop.eup %1188 }
 0x17d   : > { %v1191_v15 = vpop.eup %1190  ;;  %v700_v16 = vpack.c.bf16 %v1189_v14, %v1185_v12 }
 0x17e   : > { %v701_v17 = vpack.c.bf16 %v1187_v13, %v1191_v15 }
 0x17f   : > { %704 = vst [vmem:[%s333_s17 + $0x10] sm:$0xff] %v700_v16 }
 0x180   : > { %705 = vst [vmem:[%s333_s17 + $0x18] sm:$0xff] %v701_v17 }
 0x181   : > { %1339 = shalt.err (!%p1336_p1)
}
 0x182   : > { %s1411_s3 = smov 256   ;;  %s1412_s5 = smov 512  }
 0x183   : > { %s1413_s23 = smov 16  }
 0x184   : > { %1091 = dma.vmem_to_hbm [thread:$0]  (%p1496_p8), %s723_s7, 512, %s725_s26, %s707_s21, %s1411_s3, %s1412_s5, %s1413_s23  }
 0x185 PF: > { %s1735_s29 = sld [smem:[#allocation14_spill]]  ;;  %p1108_p2 = pnand %p855_p0, %p1500_p9 }
 0x186   : > { %s1737_s28 = sld [smem:[#allocation15_spill]] }
 0x187   : > { %p1109_p4 = pneg %p1108_p2 }
 0x18b   : > { %s739_s9 = sand.u32 1, %s1735_s29  }
 0x18c   : > { %s740_s12 = scalar_lea.sflag [#allocation4], %s739_s9 }
 0x18d   : > { %1377 = dma.done.wait (%p1109_p4), %s740_s12, 512  }
 0x18e   : > { %1379 = vsyncadd (%p1109_p4), %s740_s12, 4294966784  ;;  %s20_s23 = sadd.s32 1, %s1737_s28   ;;  %s1738_s14 = sld [smem:[#allocation19_spill]] }
 0x18f   : > { %p17_p6 = scmp.ge.s32.totalorder %s20_s23, 4   ;;  %s1739_s15 = sld [smem:[#allocation18_spill]] }
 0x190   : > { %s1740_s18 = smov %s1386_s19  ;;  %s1741_s19 = smov %s1390_s20 }
 0x191   : > { %s1743_s21 = smov %s1398_s22  ;;  %19 = sbr.rel (!%p17_p6) target bundleno = 11 (0xb), region = 104 }
 0x194   : > { %s1742_s20 = smov %s1738_s14 }
 0x195   : > { %s1744_s22 = smov %s1739_s15 }
 0x196   :  { %746 = vsyncpa [#allocation3], 1 }
 0x197   :  { %748 = vsyncpa [#allocation3 + $0x1], 1 }
 0x198   :  { %749 = vsyncpa [#allocation6], 1 }
 0x199   :  { %750 = vsyncpa [#allocation4], 1 }
 0x19a   :  { %752 = vsyncpa [#allocation4 + $0x1], 1 }

</bundles_post_ra>
